<compile_context>
chip_gen: v7x
topology: tpu7x:2x2x1
jax: 0.10.0
libtpu: 0.0.40
codegen_flags: <defaults>
</compile_context>

<pallas_src>
import jax
import jax.numpy as jnp
from jax import lax
from jax.experimental import pallas as pl
from jax.experimental.pallas import tpu as pltpu

# ---------------- model dims (small, consistent with the forward) -----------
B = 4        # batch
C = 4        # patchtst n_vars (channels)
L = 16       # patchtst sequence length
F1 = C * L   # flattened patchtst features                      (64)
D1 = 32      # patchtst tower output dim

S = 8        # transformer sequence length
E = 32       # transformer embed dim
F2 = S * E   # flattened transformer features                   (256)
D2 = 32      # transformer tower output dim

OUT = D1 + D2          # real output width                      (64)
OUT_PAD = 128          # lane-dense output width


def dual_tower_kernel(x1_ref, x2_ref, w1_ref, w2_ref, b_ref, o_ref):
    # Cast activations to bf16 in-register (cheap VPU pack); weights already
    # live in bf16.  Two MXU passes (K = 64 and K = 256) accumulate in f32
    # into a single [B, OUT_PAD] tile — this IS the torch.cat, encoded in the
    # column layout of the two weight blocks.
    x1 = x1_ref[...].astype(jnp.bfloat16)
    x2 = x2_ref[...].astype(jnp.bfloat16)
    h = jnp.dot(x1, w1_ref[...], preferred_element_type=jnp.float32)
    h = h + jnp.dot(x2, w2_ref[...], preferred_element_type=jnp.float32)
    h = h + b_ref[...]                                    # f32 bias, broadcast

    # Per-column-range activation in f32: ReLU on tower-1 columns, GELU on the
    # rest.  Padding columns (>= OUT) have zero weights/bias -> gelu(0) == 0.
    col = lax.broadcasted_iota(jnp.int32, h.shape, 1)
    act = jnp.where(col < D1, jnp.maximum(h, 0.0),
                    jax.nn.gelu(h, approximate=True))

    # One lane-dense (128-wide) store.
    o_ref[...] = act.astype(o_ref.dtype)


def build_params(key):
    """Synthetic tower parameters + the padded bf16 per-tower weight blocks."""
    k1, k2, k3, k4 = jax.random.split(key, 4)
    w1 = jax.random.normal(k1, (F1, D1), jnp.float32) * 0.05
    b1 = jax.random.normal(k2, (1, D1), jnp.float32) * 0.01
    w2 = jax.random.normal(k3, (E, D2), jnp.float32) * 0.05
    b2 = jax.random.normal(k4, (1, D2), jnp.float32) * 0.01

    # Fold the mean-pool (1/S) into w2 and tile it along the S axis so that
    # src.reshape(B, S*E) @ w2_fold == mean(src, axis=1) @ w2.
    w2_fold = jnp.concatenate([w2 / S] * S, axis=0)          # [S*E, D2]

    # Tower-1 block occupies columns [0, D1); tower-2 block columns [D1, OUT).
    w1_pad = jnp.zeros((F1, OUT_PAD), jnp.float32).at[:, :D1].set(w1)
    w2_pad = jnp.zeros((F2, OUT_PAD), jnp.float32).at[:, D1:OUT].set(w2_fold)
    b_big = (jnp.zeros((1, OUT_PAD), jnp.float32)
             .at[:, :D1].set(b1).at[:, D1:OUT].set(b2))

    # Weights carried in bf16 (halves the dominant HBM->VMEM DMA); bias stays f32.
    fused = (w1_pad.astype(jnp.bfloat16), w2_pad.astype(jnp.bfloat16), b_big)
    return (w1, b1, w2, b2), fused


@jax.jit
def dual_tower_forward(patchtst_input, transformer_input, fused_params):
    """patchtst_input: [B, C, L]; transformer_input: tuple with src [B, S, E]."""
    (src,) = transformer_input
    w1_pad, w2_pad, b_big = fused_params

    # Contiguous reshapes only (bitcasts) — no wrapper-side concat or pad.
    x1_flat = patchtst_input.reshape(B, F1)                  # torch-style flatten
    x2_flat = src.reshape(B, F2)

    out = pl.pallas_call(
        dual_tower_kernel,
        out_shape=jax.ShapeDtypeStruct((B, OUT_PAD), jnp.float32),
        in_specs=[
            pl.BlockSpec(memory_space=pltpu.MemorySpace.VMEM),   # x1_flat
            pl.BlockSpec(memory_space=pltpu.MemorySpace.VMEM),   # x2_flat
            pl.BlockSpec(memory_space=pltpu.MemorySpace.VMEM),   # w1 block (bf16)
            pl.BlockSpec(memory_space=pltpu.MemorySpace.VMEM),   # w2 block (bf16)
            pl.BlockSpec(memory_space=pltpu.MemorySpace.VMEM),   # fused bias (f32)
        ],
        out_specs=pl.BlockSpec(memory_space=pltpu.MemorySpace.VMEM),
    )(x1_flat, x2_flat, w1_pad, w2_pad, b_big)

    # NOTE: for production batch sizes, grid over >=128-row batch tiles
    # (BlockSpec((128, F), ...)) and pass
    # compiler_params=pltpu.CompilerParams(dimension_semantics=("parallel",))
    # to shard the batch axis across v7x's 2 TensorCores.
    return out[:, :OUT]


def reference_forward_bf16(patchtst_input, transformer_input, fused_params):
    """Pure-JAX reference using the SAME bf16-rounded operands (f32 math)."""
    (src,) = transformer_input
    w1_pad, w2_pad, b_big = fused_params
    x1 = patchtst_input.reshape(B, F1).astype(jnp.bfloat16).astype(jnp.float32)
    x2 = src.reshape(B, F2).astype(jnp.bfloat16).astype(jnp.float32)
    h = (x1 @ w1_pad.astype(jnp.float32)
         + x2 @ w2_pad.astype(jnp.float32) + b_big)
    col = lax.broadcasted_iota(jnp.int32, h.shape, 1)
    act = jnp.where(col < D1, jnp.maximum(h, 0.0),
                    jax.nn.gelu(h, approximate=True))
    return act[:, :OUT]


def reference_forward_f32(patchtst_input, transformer_input, params):
    """Full-f32 reference of the original two-tower forward."""
    (src,) = transformer_input
    w1, b1, w2, b2 = params
    x1 = patchtst_input.reshape(B, F1)
    t1 = jnp.maximum(x1 @ w1 + b1, 0.0)
    t2 = jax.nn.gelu(jnp.mean(src, axis=1) @ w2 + b2, approximate=True)
    return jnp.concatenate([t1, t2], axis=-1)


if __name__ == "__main__":
    key = jax.random.PRNGKey(0)
    kp, k5, k6 = jax.random.split(key, 3)

    params, fused_params = build_params(kp)

    # deterministic example inputs
    patchtst_input = jax.random.normal(k5, (B, C, L), jnp.float32)
    src = jax.random.normal(k6, (B, S, E), jnp.float32)
    transformer_input = (src,)

    out = dual_tower_forward(patchtst_input, transformer_input, fused_params)
    out = jax.block_until_ready(out)
    assert out.shape == (B, OUT)

    # Tight check vs. a reference using the same bf16-rounded operands
    # (isolates MXU accumulation-order differences only).
    ref_bf16 = reference_forward_bf16(patchtst_input, transformer_input,
                                      fused_params)
    assert jnp.allclose(out, ref_bf16, atol=1e-4, rtol=1e-4)

    # Loose check vs. the full-f32 two-tower reference (bf16 weight rounding).
    ref_f32 = reference_forward_f32(patchtst_input, transformer_input, params)
    assert jnp.allclose(out, ref_f32, atol=3e-2, rtol=3e-2)

    print("KERNEL_OK")
</pallas_src>

<mosaic_0001>
module attributes {stable_mosaic.version = 11 : i64} {
  func.func @dual_tower_kernel(%arg0: memref<4x64xf32, #tpu.memory_space<vmem>>, %arg1: memref<4x256xf32, #tpu.memory_space<vmem>>, %arg2: memref<64x128xbf16, #tpu.memory_space<vmem>>, %arg3: memref<256x128xbf16, #tpu.memory_space<vmem>>, %arg4: memref<1x128xf32, #tpu.memory_space<vmem>>, %arg5: memref<4x128xf32, #tpu.memory_space<vmem>>) attributes {dimension_semantics = [], scalar_prefetch = 0 : i64, scratch_operands = 0 : i64, tpu.core_type = #tpu.core_type<tc>} {
    %c0 = arith.constant 0 : index
    %c0_0 = arith.constant 0 : index
    %0 = vector.load %arg0[%c0, %c0_0] : memref<4x64xf32, #tpu.memory_space<vmem>>, vector<4x64xf32>
    %1 = arith.truncf %0 : vector<4x64xf32> to vector<4x64xbf16>
    %c0_1 = arith.constant 0 : index
    %c0_2 = arith.constant 0 : index
    %2 = vector.load %arg1[%c0_1, %c0_2] : memref<4x256xf32, #tpu.memory_space<vmem>>, vector<4x256xf32>
    %3 = arith.truncf %2 : vector<4x256xf32> to vector<4x256xbf16>
    %c0_3 = arith.constant 0 : index
    %c0_4 = arith.constant 0 : index
    %4 = vector.load %arg2[%c0_3, %c0_4] : memref<64x128xbf16, #tpu.memory_space<vmem>>, vector<64x128xbf16>
    %cst = arith.constant dense<0.000000e+00> : vector<4x128xf32>
    %5 = tpu.matmul %1, %4, %cst {dimension_numbers = #tpu.dot_dimension_numbers<[1], [0], [0], [1], [0, 0, 1, 1], [], []>} : vector<4x64xbf16>, vector<64x128xbf16>, vector<4x128xf32> -> vector<4x128xf32>
    %c0_5 = arith.constant 0 : index
    %c0_6 = arith.constant 0 : index
    %6 = vector.load %arg3[%c0_5, %c0_6] : memref<256x128xbf16, #tpu.memory_space<vmem>>, vector<256x128xbf16>
    %cst_7 = arith.constant dense<0.000000e+00> : vector<4x128xf32>
    %7 = tpu.matmul %3, %6, %cst_7 {dimension_numbers = #tpu.dot_dimension_numbers<[1], [0], [0], [1], [0, 0, 1, 1], [], []>} : vector<4x256xbf16>, vector<256x128xbf16>, vector<4x128xf32> -> vector<4x128xf32>
    %8 = arith.addf %5, %7 : vector<4x128xf32>
    %c0_8 = arith.constant 0 : index
    %c0_9 = arith.constant 0 : index
    %9 = vector.load %arg4[%c0_8, %c0_9] : memref<1x128xf32, #tpu.memory_space<vmem>>, vector<1x128xf32>
    %10 = vector.broadcast %9 : vector<1x128xf32> to vector<4x128xf32>
    %11 = arith.addf %8, %10 : vector<4x128xf32>
    %12 = tpu.iota {dimensions = array<i32: 1>} : vector<4x128xi32>
    %c32_i32 = arith.constant 32 : i32
    %13 = vector.broadcast %c32_i32 : i32 to vector<4x128xi32>
    %14 = arith.cmpi slt, %12, %13 : vector<4x128xi32>
    %cst_10 = arith.constant 0.000000e+00 : f32
    %15 = vector.broadcast %cst_10 : f32 to vector<4x128xf32>
    %16 = arith.maximumf %11, %15 : vector<4x128xf32>
    %17 = arith.mulf %11, %11 : vector<4x128xf32>
    %18 = arith.mulf %11, %17 : vector<4x128xf32>
    %cst_11 = arith.constant 4.471500e-02 : f32
    %19 = vector.broadcast %cst_11 : f32 to vector<4x128xf32>
    %20 = arith.mulf %19, %18 : vector<4x128xf32>
    %21 = arith.addf %11, %20 : vector<4x128xf32>
    %cst_12 = arith.constant 0.797884583 : f32
    %22 = vector.broadcast %cst_12 : f32 to vector<4x128xf32>
    %23 = arith.mulf %22, %21 : vector<4x128xf32>
    %24 = math.tanh %23 : vector<4x128xf32>
    %cst_13 = arith.constant 1.000000e+00 : f32
    %25 = vector.broadcast %cst_13 : f32 to vector<4x128xf32>
    %26 = arith.addf %25, %24 : vector<4x128xf32>
    %cst_14 = arith.constant 5.000000e-01 : f32
    %27 = vector.broadcast %cst_14 : f32 to vector<4x128xf32>
    %28 = arith.mulf %27, %26 : vector<4x128xf32>
    %29 = arith.mulf %11, %28 : vector<4x128xf32>
    %30 = arith.select %14, %16, %29 : vector<4x128xi1>, vector<4x128xf32>
    %c0_15 = arith.constant 0 : index
    %c0_16 = arith.constant 0 : index
    %31 = vector.load %arg5[%c0_15, %c0_16] : memref<4x128xf32, #tpu.memory_space<vmem>>, vector<4x128xf32>
    tpu.vector_store %arg5[%c0_15, %c0_16], %30 {strides = array<i32>} : memref<4x128xf32, #tpu.memory_space<vmem>>, vector<4x128xf32>,
    return
  }
}

</mosaic_0001>

<bundles_post_ra>
// kernel: dual_tower_forward.1
= control target key start
LH: loop header
LB: loop body
LE: loop exit
PB: predicated region body
PF: predicated region fallthrough
CT: control target
= control target key end

     0   :  { %10 = vsyncpa [#allocation3], 0  ;;  %s545_s0 = inlined_call_operand.vmem [shape: f32[4,64], index: 0, kind: input, shape index: {}]   ;;  %s546_s1 = inlined_call_operand.vmem [shape: f32[4,256], index: 1, kind: input, shape index: {}]   ;;  %s547_s2 = inlined_call_operand.vmem [shape: bf16[64,128], index: 2, kind: input, shape index: {}]   ;;  %s548_s3 = inlined_call_operand.hbm [shape: bf16[256,128], index: 3, kind: input, shape index: {}]   ;;  %s549_s4 = inlined_call_operand.vmem [shape: f32[1,128], index: 4, kind: input, shape index: {}]   ;;  %s550_s5 = inlined_call_operand.hbm [shape: f32[4,128], index: 5, kind: output, shape index: {}]  }
   0x1   :  { %11 = vsyncpa [#allocation4], 0  ;;  %s464_s18 = smov [#allocation2]   ;;  %s416_s22 = scalar_lea.hbm %s548_s3, 2048 }
   0x2   :  { %s23_s19 = sshll.u32 %s464_s18, 4  ;;  %p417_p0 = scmp.ne.s32.totalorder %s548_s3, %s416_s22  ;;  %s24_s19 = int_to_ptr.vmem [resolvable:$true] %s23_s19 }
   0x3   :  { %p420_p1 = scmp.lt.u32.totalorder %s416_s22, %s548_s3 }
   0x5   :  { %p422_p2 = pnand %p420_p1, %p417_p0 }
   0x7   :  { %425 = shalt.err (!%p422_p2)
}
   0x8   :  { %s426_s27 = scalar_lea.vmem %s24_s19, 2048  ;;  %p431_p4 = scmp.lt.s32.totalorder %s24_s19, %s24_s19 }
   0x9   :  { %p427_p3 = scmp.ne.s32.totalorder %s24_s19, %s426_s27  ;;  %p432_p5 = scmp.lt.s32.totalorder %s426_s27, %s426_s27 }
   0xb   :  { %p433_p6 = por %p432_p5, %p431_p4 }
   0xd   :  { %p434_p7 = pnand %p433_p6, %p427_p3 }
   0xf   :  { %437 = shalt.err (!%p434_p7)
}
  0x10   :  { %s465_s28 = smov 64   ;;  %s466_s29 = smov 4  }
  0x11   :  { %29 = dma.hbm_to_vmem [thread:$0]  %s548_s3, 2048, %s24_s19, [#allocation3], %s465_s28, %s465_s28, %s466_s29  }
  0x12   :  { %460 = dma.done.wait [#allocation3], 2048  }
  0x13   :  { %461 = vsyncadd [#allocation3], 4294965248  ;;  %v467_v0 = vmov 0.0   ;;  %vm468_vm0 = vmmov 0   ;;  %v393_v1 = vld [vmem:[#allocation2 + $0x40] sm:$0xff]   ;;  %v395_v3 = vld [vmem:[#allocation2 + $0x48] sm:$0xff]   ;;  %v296_v44 = vlaneseq }
  0x14   :  { %375 = vmatprep.subr.bf16.mxu1 %v467_v0  ;;  %383 = vmatprep.mubr.msk.bf16.mxu1 %vm468_vm0, %v467_v0  ;;  %v394_v2 = vld [vmem:[#allocation2] sm:$0xff]   ;;  %v396_v4 = vld [vmem:[#allocation2 + $0x8] sm:$0xff]   ;;  %v397_v5 = vld [vmem:[#allocation2 + $0x50] sm:$0xff]   ;;  %vm244_vm1 = vcmask 523264  }
  0x15   :  { %348 = vmatprep.subr.bf16.mxu0 %v393_v1  ;;  %v398_v6 = vld [vmem:[#allocation2 + $0x10] sm:$0xff]   ;;  %v399_v7 = vld [vmem:[#allocation2 + $0x58] sm:$0xff]   ;;  %v401_v10 = vld [vmem:[#allocation2 + $0x60] sm:$0xff]   ;;  %v297_v46 = vand.u32 127, %v296_v44 }
  0x16   :  { %349 = vmatpush3.bf16.msra.mxu0 %v394_v2  ;;  %v403_v8 = vld [vmem:[%s547_s2] sm:$0xff]   ;;  %v400_v9 = vld [vmem:[#allocation2 + $0x18] sm:$0xff]   ;;  %v402_v12 = vld [vmem:[#allocation2 + $0x20] sm:$0xff]  }
  0x17   :  { %350 = vmatprep.subr.bf16.mxu0 %v395_v3  ;;  %376 = vmatpush3.bf16.msra.mxu1 %v403_v8  ;;  %v406_v11 = vld [vmem:[%s547_s2 + $0x8] sm:$0xff]   ;;  %v404_v13 = vld [vmem:[#allocation2 + $0x68] sm:$0xff]   ;;  %v409_v14 = vld [vmem:[%s547_s2 + $0x10] sm:$0xff]   ;;  %vm298_vm2 = vcmp.lt.s32.totalorder %v297_v46, 32 }
  0x18   :  { %377 = vmatprep.subr.bf16.mxu1 %v467_v0  ;;  %v405_v15 = vld [vmem:[#allocation2 + $0x28] sm:$0xff]   ;;  %v407_v16 = vld [vmem:[#allocation2 + $0x70] sm:$0xff]   ;;  %v410_v24 = vld [vmem:[#allocation2 + $0x78] sm:$0xff]  }
  0x19   :  { %v412_v17 = vld [vmem:[%s547_s2 + $0x18] sm:$0xff]   ;;  %v38_v18 = vld [vmem:[%s546_s1] sm:$0xff]  ;;  %v411_v25 = vld [vmem:[#allocation2 + $0x38] sm:$0xff]   ;;  %s469_s2 = smov [#allocation5]  }
  0x1a   :  { %351 = vmatpush3.bf16.msra.mxu0 %v396_v4  ;;  %v36_v19 = vld [vmem:[%s545_s0] sm:$0xf]  ;;  %v40_v20 = vcombine.high %v38_v18, %v38_v18  ;;  %v42_v26 = vpack.c.bf16 %v38_v18, %v38_v18  ;;  %s317_s18 = sshll.u32 %s469_s2, 4  ;;  %s318_s18 = int_to_ptr.vmem [resolvable:$true] %s317_s18 }
  0x1b   :  { %352 = vmatprep.subr.bf16.mxu0 %v397_v5  ;;  %378 = vmatpush3.bf16.msra.mxu1 %v406_v11  ;;  %v408_v21 = vld [vmem:[#allocation2 + $0x30] sm:$0xff]   ;;  %v37_v23 = vpack.c.bf16 %v36_v19, %v36_v19  ;;  %p443_p9 = scmp.lt.s32.totalorder %s318_s18, %s318_s18 }
  0x1c   :  { %379 = vmatprep.subr.bf16.mxu1 %v467_v0  ;;  %v43_v22 = vpack.c.bf16 %v40_v20, %v40_v20  ;;  %v347_v35 = vld [vmem:[%s549_s4] ss:$0 sm:$0xff]  ;;  %s438_s4 = scalar_lea.vmem %s318_s18, 64 }
  0x1d   :  { %p439_p8 = scmp.ne.s32.totalorder %s318_s18, %s438_s4  ;;  %p444_p10 = scmp.lt.s32.totalorder %s438_s4, %s438_s4 }
  0x1e   :  { %353 = vmatpush3.bf16.msra.mxu0 %v398_v6  ;;  %212 = vmatprep.mubr.bf16.mxu0 %v43_v22 }
  0x1f   :  { %354 = vmatprep.subr.bf16.mxu0 %v399_v7  ;;  %380 = vmatpush3.bf16.msra.mxu1 %v409_v14  ;;  %p445_p11 = por %p444_p10, %p443_p9 }
  0x20   :  { %381 = vmatprep.subr.bf16.mxu1 %v467_v0 }
  0x21   :  { %p446_p12 = pnand %p445_p11, %p439_p8 }
  0x22   :  { %355 = vmatpush3.bf16.msra.mxu0 %v400_v9 }
  0x23   :  { %356 = vmatprep.subr.bf16.mxu0 %v401_v10  ;;  %382 = vmatpush3.bf16.msra.mxu1 %v412_v17 }
  0x26   :  { %357 = vmatpush3.bf16.msra.mxu0 %v402_v12  ;;  %384 = vmatmul.mubr.msk.bf16.vlgmr.msra.gmra.mrb[0].mxu1 %vm244_vm1, %v37_v23 }
  0x27   :  { %358 = vmatprep.subr.bf16.mxu0 %v404_v13 }
  0x2a   :  { %359 = vmatpush3.bf16.msra.mxu0 %v405_v15 }
  0x2b   :  { %360 = vmatprep.subr.bf16.mxu0 %v407_v16 }
  0x2e   :  { %361 = vmatpush3.bf16.msra.mxu0 %v408_v21 }
  0x2f   :  { %362 = vmatprep.subr.bf16.mxu0 %v410_v24 }
  0x32   :  { %363 = vmatpush3.bf16.msra.mxu0 %v411_v25 }
  0x35   :  { %213 = vmatmul.mubr.bf16.vlgmr.msra.gmra.mrb[0].mxu0 %v42_v26 }
  0xf9   :  { %v282_v27 = vpop.f32.mrb[0].mxu1 }
  0xfa   :  { %v385_v28 = vpop.f32.mrb[1].mxu1 }
  0xfb   :  { %v285_v29 = vpop.f32.mrb[2].mxu1 }
  0xfc   :  { %v386_v30 = vpop.f32.mrb[3].mxu1 }
 0x108   :  { %v364_v31 = vpop.f32.mrb[0].mxu0 }
 0x109   :  { %v365_v32 = vpop.f32.mrb[1].mxu0 }
 0x10a   :  { %v366_v33 = vadd.f32 %v365_v32, %v364_v31  ;;  %v367_v34 = vpop.f32.mrb[2].mxu0 }
 0x10b   :  { %v368_v36 = vpop.f32.mrb[3].mxu0 }
 0x10c   :  { %v283_v37 = vadd.f32 %v366_v33, %v282_v27 }
 0x10e   :  { %v295_v38 = vadd.f32 %v347_v35, %v283_v37 }
 0x110   :  { %v300_v39 = vmul.f32 %v295_v38, %v295_v38  ;;  %v299_v49 = vmax.f32 %v295_v38, 0.0 }
 0x112   :  { %v301_v40 = vmul.f32 %v300_v39, %v295_v38 }
 0x114   :  { %v302_v41 = vmul.f32 0.044715, %v301_v40 }
 0x116   :  { %v303_v42 = vadd.f32 %v302_v41, %v295_v38 }
 0x118   :  { %v304_v43 = vmul.f32 0.7978846, %v303_v42 }
 0x11a   :  { %414 = vtanh.f32 %v304_v43 }
 0x124   :  { %v415_v45 = vpop.eup %414 }
 0x125   :  { %v306_v47 = vadd.f32 1.0, %v415_v45 }
 0x127   :  { %v307_v48 = vmul.f32 0.5, %v306_v47 }
 0x129   :  { %v308_v50 = vmul.f32 %v307_v48, %v295_v38 }
 0x12b   :  { %v309_v51 = vsel %vm298_vm2, %v299_v49, %v308_v50 }
 0x12c   :  { %310 = vst [vmem:[#allocation5] sm:$0xf] %v309_v51 }
 0x12d   :  { %449 = shalt.err (!%p446_p12)
}
 0x12e   :  { %s450_s21 = scalar_lea.hbm %s550_s5, 64 }
 0x12f   :  { %p451_p13 = scmp.ne.s32.totalorder %s550_s5, %s450_s21  ;;  %p454_p0 = scmp.lt.u32.totalorder %s450_s21, %s550_s5 }
 0x131   :  { %p456_p1 = pnand %p454_p0, %p451_p13 }
 0x133   :  { %459 = shalt.err (!%p456_p1)
}
 0x134   :  { %320 = dma.vmem_to_hbm [thread:$0]  %s318_s18, 64, %s550_s5, [#allocation4]  }
 0x135   :  { %462 = dma.done.wait [#allocation4], 64  }
 0x136   :  { %463 = vsyncadd [#allocation4], 4294967232 }
 0x137   :  { %324 = vsyncpa [#allocation3], 1 }
 0x138   :  { %325 = vsyncpa [#allocation4], 1 }

</bundles_post_ra>
